<compile_context>
chip_gen: v7x
topology: tpu7x:2x2x1
jax: 0.10.0
libtpu: 0.0.40
codegen_flags: <defaults>
</compile_context>

<pallas_src>
import jax
import jax.numpy as jnp
from jax.experimental import pallas as pl
from jax.experimental.pallas import tpu as pltpu

_LANE = 128
_SUBLANE = 8


def _round_up(x, m):
    return (x + m - 1) // m * m


def _cdiv(a, b):
    return -(-a // b)


def _vmem_caps():
    """(scoped vmem limit, planning budget) derived from this chip's VMEM."""
    cap = None
    try:
        info = pltpu.get_tpu_info()
        cap = int(getattr(info, "vmem_capacity_bytes", 0)) or None
    except Exception:  # query is best-effort; fall back to the smallest part
        cap = None
    if cap is None:
        cap = 64 * 1024 * 1024                      # v7x-safe default
    cap = max(32 * 1024 * 1024, min(cap, 256 * 1024 * 1024))
    limit = min(int(cap * 0.85), cap - (4 << 20))   # scoped cap, below physical
    budget = int(cap * 0.70)                        # what our buffers may plan for
    return limit, budget


def _pad2(a, shape, dtype):
    """Zero-pad a 2-D array to `shape` and cast to `dtype` (no-op if already so)."""
    if a.shape == shape and a.dtype == jnp.dtype(dtype):
        return a
    out = jnp.zeros(shape, dtype)
    return out.at[: a.shape[0], : a.shape[1]].set(a.astype(dtype))


def _ff_kernel(x_ref, w1_ref, b1_ref, w2_ref, b2_ref, o_ref, acc_ref):
    """One (token-tile, d_ff-chunk) step of  y = tanh(x @ W1 + b1) @ W2 + b2."""
    j = pl.program_id(1)                            # d_ff reduction axis (last)

    @pl.when(j == 0)
    def _():
        acc_ref[...] = jnp.zeros_like(acc_ref)

    # fc1 chunk: x is already stored in the MXU dtype; accumulate in f32.
    h = jnp.dot(x_ref[...], w1_ref[...], preferred_element_type=jnp.float32)
    h = jnp.tanh(h + b1_ref[...])                   # biases are f32
    # fc2 chunk accumulates into the resident f32 scratch.
    acc_ref[...] += jnp.dot(h.astype(w2_ref.dtype), w2_ref[...],
                            preferred_element_type=jnp.float32)

    @pl.when(j == pl.num_programs(1) - 1)
    def _():
        o_ref[...] = (acc_ref[...] + b2_ref[...]).astype(o_ref.dtype)


def make_position_wise_ff(w1, b1, w2, b2, *, tile_m=512, tile_ff=None, mxu_dtype=None):
    """Pads/casts the parameters once and returns  apply(x) = fc2(tanh(fc1(x))).

    w1: (d_model, d_ff)   (transposed vs. torch nn.Linear.weight)
    b1: (d_ff,)
    w2: (d_ff, d_model)
    b2: (d_model,)
    mxu_dtype: optional matmul-input dtype (e.g. jnp.bfloat16 -- fine on v5e,
               v6e and v7x); bias add, tanh and accumulation stay f32.
    """
    d_model, d_ff = w1.shape
    assert w2.shape == (d_ff, d_model)
    assert b1.shape[-1] == d_ff and b2.shape[-1] == d_model

    compute_dtype = jnp.dtype(mxu_dtype) if mxu_dtype is not None else jnp.dtype(w1.dtype)
    w_bytes = compute_dtype.itemsize
    x_bytes = w_bytes                               # x is pre-cast to the MXU dtype
    out_bytes_plan = 4                              # plan conservatively (f32 output)

    vmem_limit, vmem_budget = _vmem_caps()

    d_model_p = _round_up(d_model, _LANE)
    d_ff_aligned = _round_up(d_ff, _LANE)

    # Sub-32-bit activations pack along sublanes: bf16 token tiles need 16-alignment.
    sub_m = _SUBLANE * max(1, 4 // x_bytes)
    tile_m_cap = max(sub_m, _round_up(int(tile_m), sub_m))

    # ---- VMEM planning (includes the fc1 intermediate h, per perf review) ----
    def act_bytes(tm):
        # x tile (2 bufs) + out tile (2 bufs) + f32 accumulator + b2.
        return (2 * tm * d_model_p * x_bytes
                + 2 * tm * d_model_p * out_bytes_plan
                + tm * d_model_p * 4
                + d_model_p * 4)

    def ff_bytes(tm, tff, bufs):
        w_chunk = bufs * (d_model_p * tff * w_bytes + tff * 4 + tff * d_model_p * w_bytes)
        h_chunk = tm * tff * (4 + (w_bytes if w_bytes < 4 else 0))   # h f32 + narrow copy
        return w_chunk + h_chunk

    def fits(tm, tff, bufs):
        return act_bytes(tm) + ff_bytes(tm, tff, bufs) <= vmem_budget

    have_buffered = hasattr(pl, "Buffered")
    resident_bufs = 1 if have_buffered else 2

    # ---- d_ff tile: whole d_ff resident if it (and h) fit, else a >=256 chunk ----
    if tile_ff is None:
        if fits(tile_m_cap, d_ff_aligned, resident_bufs):
            tile_ff_sel = d_ff_aligned
        else:
            ff_floor = min(d_ff_aligned, 2 * _LANE)   # 256 fills v6e/v7x MXUs
            tile_ff_sel = ff_floor
            for cand in (4096, 2048, 1024, 512, 256):
                if ff_floor <= cand <= d_ff_aligned and fits(tile_m_cap, cand, 2):
                    tile_ff_sel = cand
                    break
    else:
        tile_ff_sel = _round_up(int(tile_ff), _LANE)

    d_ff_p = _round_up(d_ff, tile_ff_sel)
    n_ff = d_ff_p // tile_ff_sel
    weights_const = (n_ff == 1)

    # ---- pad / cast parameters ONCE (reused across calls) ---------------------
    # Zero padding is exact: padded d_ff columns give tanh(0)=0 and hit zero rows
    # of W2; padded d_model output columns are zero and sliced off.
    w1_p = _pad2(w1, (d_model_p, d_ff_p), compute_dtype)
    w2_p = _pad2(w2, (d_ff_p, d_model_p), compute_dtype)
    b1_p = _pad2(b1.reshape(1, d_ff), (1, d_ff_p), jnp.float32)
    b2_p = _pad2(b2.reshape(1, d_model), (1, d_model_p), jnp.float32)

    def apply(x):
        assert x.shape[-1] == d_model
        orig_shape = x.shape
        x2 = x.reshape(-1, d_model)
        n = x2.shape[0]
        out_dtype = x.dtype
        out_bytes = jnp.dtype(out_dtype).itemsize

        # ---- token tile: big (amortize step overhead, raise flop/weight-byte),
        #      then split so both v7x TensorCores get grid work, then clamp to VMEM.
        tm = min(tile_m_cap, _round_up(max(n, 1), sub_m))
        while tm > sub_m and _cdiv(max(n, 1), tm) < 2:
            tm = max(sub_m, _round_up(tm // 2, sub_m))
        bufs = resident_bufs if weights_const else 2
        while tm > sub_m and not fits(tm, tile_ff_sel, bufs):
            tm = max(sub_m, _round_up(tm // 2, sub_m))

        n_p = _round_up(max(n, 1), tm)
        n_m = n_p // tm

        # x padded AND pre-cast to the MXU dtype (no per-step cast, half the DMA in bf16).
        x_p = _pad2(x2, (n_p, d_model_p), compute_dtype)

        cost = pl.CostEstimate(
            flops=4 * n * d_model * d_ff,
            transcendentals=n * d_ff,
            bytes_accessed=(n * d_model * x_bytes
                            + 2 * d_model * d_ff * w_bytes
                            + (d_ff + d_model) * 4
                            + n * d_model * out_bytes),
        )

        def build(use_single_buffer):
            def spec(shape, index_map, const=False):
                if const and use_single_buffer:
                    # Constant-index blocks: no need for double-buffering VMEM.
                    return pl.BlockSpec(shape, index_map, pipeline_mode=pl.Buffered(1))
                return pl.BlockSpec(shape, index_map)

            grid_spec = pltpu.PrefetchScalarGridSpec(
                num_scalar_prefetch=0,
                grid=(n_m, n_ff),                                     # reduction axis last
                in_specs=[
                    spec((tm, d_model_p), lambda i, j: (i, 0)),                       # x
                    spec((d_model_p, tile_ff_sel), lambda i, j: (0, j), weights_const),  # W1
                    spec((1, tile_ff_sel), lambda i, j: (0, j), weights_const),          # b1
                    spec((tile_ff_sel, d_model_p), lambda i, j: (j, 0), weights_const),  # W2
                    spec((1, d_model_p), lambda i, j: (0, 0), True),                     # b2
                ],
                out_specs=spec((tm, d_model_p), lambda i, j: (i, 0)),
                scratch_shapes=[pltpu.VMEM((tm, d_model_p), jnp.float32)],
            )
            return pl.pallas_call(
                _ff_kernel,
                out_shape=jax.ShapeDtypeStruct((n_p, d_model_p), out_dtype),
                grid_spec=grid_spec,
                cost_estimate=cost,
                compiler_params=pltpu.CompilerParams(
                    dimension_semantics=("parallel", "arbitrary"),
                    vmem_limit_bytes=vmem_limit,
                ),
            )

        if have_buffered:
            try:
                out_p = build(True)(x_p, w1_p, b1_p, w2_p, b2_p)
            except (pltpu.LoweringException, NotImplementedError, TypeError, ValueError):
                # Narrow fallback for jax versions where pipeline_mode=pl.Buffered(1)
                # is not supported by the TPU lowering; everything else unchanged.
                out_p = build(False)(x_p, w1_p, b1_p, w2_p, b2_p)
        else:
            out_p = build(False)(x_p, w1_p, b1_p, w2_p, b2_p)

        out = out_p[:n, :d_model]
        return out.reshape(*orig_shape[:-1], d_model)

    return apply


def position_wise_ff(x, w1, b1, w2, b2, *, tile_m=512, tile_ff=None, mxu_dtype=None):
    """One-shot convenience wrapper:  fc2(tanh(fc1(x)))."""
    return make_position_wise_ff(w1, b1, w2, b2, tile_m=tile_m, tile_ff=tile_ff,
                                 mxu_dtype=mxu_dtype)(x)


if __name__ == "__main__":
    key = jax.random.PRNGKey(0)

    # --- Test 1: toy module shapes (batch=2, seq=8, d_model=32, d_ff=64), f32 path,
    #     resident weights (n_ff == 1), token padding + megacore token split.
    batch, seq, d_model, d_ff = 2, 8, 32, 64
    kx, kw1, kb1, kw2, kb2, k2 = jax.random.split(key, 6)
    x = jax.random.normal(kx, (batch, seq, d_model), dtype=jnp.float32)
    lim1 = 1.0 / (d_model ** 0.5)
    lim2 = 1.0 / (d_ff ** 0.5)
    w1 = jax.random.uniform(kw1, (d_model, d_ff), jnp.float32, -lim1, lim1)
    b1 = jax.random.uniform(kb1, (d_ff,), jnp.float32, -lim1, lim1)
    w2 = jax.random.uniform(kw2, (d_ff, d_model), jnp.float32, -lim2, lim2)
    b2 = jax.random.uniform(kb2, (d_model,), jnp.float32, -lim2, lim2)

    out = position_wise_ff(x, w1, b1, w2, b2)
    jax.block_until_ready(out)
    ref = jnp.tanh(x @ w1 + b1) @ w2 + b2
    assert out.shape == ref.shape
    assert jnp.allclose(out, ref, atol=1e-5, rtol=1e-5), "f32 path mismatch vs reference"

    # --- Test 2: pre-padded weights via the factory, 256-wide d_ff reduction chunks
    #     (n_ff == 2), token-tail padding (272 tokens) and the bf16 MXU path.
    batch, seq, d_model, d_ff = 2, 136, 128, 512
    kx, kw1, kb1, kw2, kb2 = jax.random.split(k2, 5)
    x = jax.random.normal(kx, (batch, seq, d_model), dtype=jnp.float32)
    lim1 = 1.0 / (d_model ** 0.5)
    lim2 = 1.0 / (d_ff ** 0.5)
    w1 = jax.random.uniform(kw1, (d_model, d_ff), jnp.float32, -lim1, lim1)
    b1 = jax.random.uniform(kb1, (d_ff,), jnp.float32, -lim1, lim1)
    w2 = jax.random.uniform(kw2, (d_ff, d_model), jnp.float32, -lim2, lim2)
    b2 = jax.random.uniform(kb2, (d_model,), jnp.float32, -lim2, lim2)

    ff = make_position_wise_ff(w1, b1, w2, b2, tile_ff=256, mxu_dtype=jnp.bfloat16)
    out = ff(x)
    jax.block_until_ready(out)
    ref = jnp.tanh(x @ w1 + b1) @ w2 + b2
    assert jnp.allclose(out, ref, atol=3e-2, rtol=3e-2), "bf16 path mismatch vs reference"

    print("KERNEL_OK")
</pallas_src>

<mosaic_0001>
module attributes {stable_mosaic.version = 11 : i64} {
  func.func @_ff_kernel(%arg0: i32, %arg1: i32, %arg2: memref<8x128xf32, #tpu.memory_space<vmem>>, %arg3: memref<128x128xf32, #tpu.memory_space<vmem>>, %arg4: memref<1x128xf32, #tpu.memory_space<vmem>>, %arg5: memref<128x128xf32, #tpu.memory_space<vmem>>, %arg6: memref<1x128xf32, #tpu.memory_space<vmem>>, %arg7: memref<8x128xf32, #tpu.memory_space<vmem>>, %arg8: memref<8x128xf32, #tpu.memory_space<vmem>>) attributes {dimension_semantics = [#tpu.dimension_semantics<parallel>, #tpu.dimension_semantics<arbitrary>], iteration_bounds = array<i64: 2, 1>, scalar_prefetch = 0 : i64, scratch_operands = 1 : i64, tpu.core_type = #tpu.core_type<tc>, window_params = [{transform_indices = @transform_0, window_bounds = array<i64: 8, 128>}, {pipeline_mode = #tpu.pipeline_mode<synchronous>, transform_indices = @transform_1, window_bounds = array<i64: 128, 128>}, {pipeline_mode = #tpu.pipeline_mode<synchronous>, transform_indices = @transform_2, window_bounds = array<i64: 1, 128>}, {pipeline_mode = #tpu.pipeline_mode<synchronous>, transform_indices = @transform_3, window_bounds = array<i64: 128, 128>}, {pipeline_mode = #tpu.pipeline_mode<synchronous>, transform_indices = @transform_4, window_bounds = array<i64: 1, 128>}, {transform_indices = @transform_5, window_bounds = array<i64: 8, 128>}]} {
    %c0_i32 = arith.constant 0 : i32
    %0 = arith.cmpi eq, %arg1, %c0_i32 : i32
    %1 = arith.extui %0 : i1 to i32
    %c0_i32_0 = arith.constant 0 : i32
    %2 = arith.cmpi ne, %1, %c0_i32_0 : i32
    scf.if %2 {
      %cst_15 = arith.constant 0.000000e+00 : f32
      %18 = vector.broadcast %cst_15 : f32 to vector<8x128xf32>
      %c0_16 = arith.constant 0 : index
      %c0_17 = arith.constant 0 : index
      %19 = vector.load %arg8[%c0_16, %c0_17] : memref<8x128xf32, #tpu.memory_space<vmem>>, vector<8x128xf32>
      tpu.vector_store %arg8[%c0_16, %c0_17], %18 {strides = array<i32>} : memref<8x128xf32, #tpu.memory_space<vmem>>, vector<8x128xf32>,
    } else {
    }
    %c0 = arith.constant 0 : index
    %c0_1 = arith.constant 0 : index
    %3 = vector.load %arg2[%c0, %c0_1] : memref<8x128xf32, #tpu.memory_space<vmem>>, vector<8x128xf32>
    %c0_2 = arith.constant 0 : index
    %c0_3 = arith.constant 0 : index
    %4 = vector.load %arg3[%c0_2, %c0_3] : memref<128x128xf32, #tpu.memory_space<vmem>>, vector<128x128xf32>
    %cst = arith.constant dense<0.000000e+00> : vector<8x128xf32>
    %5 = tpu.matmul %3, %4, %cst {dimension_numbers = #tpu.dot_dimension_numbers<[1], [0], [0], [1], [0, 0, 1, 1], [], []>} : vector<8x128xf32>, vector<128x128xf32>, vector<8x128xf32> -> vector<8x128xf32>
    %c0_4 = arith.constant 0 : index
    %c0_5 = arith.constant 0 : index
    %6 = vector.load %arg4[%c0_4, %c0_5] : memref<1x128xf32, #tpu.memory_space<vmem>>, vector<1x128xf32>
    %7 = vector.broadcast %6 : vector<1x128xf32> to vector<8x128xf32>
    %8 = arith.addf %5, %7 : vector<8x128xf32>
    %9 = math.tanh %8 : vector<8x128xf32>
    %c0_6 = arith.constant 0 : index
    %c0_7 = arith.constant 0 : index
    %10 = vector.load %arg8[%c0_6, %c0_7] : memref<8x128xf32, #tpu.memory_space<vmem>>, vector<8x128xf32>
    %c0_8 = arith.constant 0 : index
    %c0_9 = arith.constant 0 : index
    %11 = vector.load %arg5[%c0_8, %c0_9] : memref<128x128xf32, #tpu.memory_space<vmem>>, vector<128x128xf32>
    %cst_10 = arith.constant dense<0.000000e+00> : vector<8x128xf32>
    %12 = tpu.matmul %9, %11, %cst_10 {dimension_numbers = #tpu.dot_dimension_numbers<[1], [0], [0], [1], [0, 0, 1, 1], [], []>} : vector<8x128xf32>, vector<128x128xf32>, vector<8x128xf32> -> vector<8x128xf32>
    %13 = arith.addf %10, %12 : vector<8x128xf32>
    %c0_11 = arith.constant 0 : index
    %c0_12 = arith.constant 0 : index
    %14 = vector.load %arg8[%c0_11, %c0_12] : memref<8x128xf32, #tpu.memory_space<vmem>>, vector<8x128xf32>
    tpu.vector_store %arg8[%c0_11, %c0_12], %13 {strides = array<i32>} : memref<8x128xf32, #tpu.memory_space<vmem>>, vector<8x128xf32>,
    %c0_i32_13 = arith.constant 0 : i32
    %15 = arith.cmpi eq, %arg1, %c0_i32_13 : i32
    %16 = arith.extui %15 : i1 to i32
    %c0_i32_14 = arith.constant 0 : i32
    %17 = arith.cmpi ne, %16, %c0_i32_14 : i32
    scf.if %17 {
      %c0_15 = arith.constant 0 : index
      %c0_16 = arith.constant 0 : index
      %18 = vector.load %arg8[%c0_15, %c0_16] : memref<8x128xf32, #tpu.memory_space<vmem>>, vector<8x128xf32>
      %c0_17 = arith.constant 0 : index
      %c0_18 = arith.constant 0 : index
      %19 = vector.load %arg6[%c0_17, %c0_18] : memref<1x128xf32, #tpu.memory_space<vmem>>, vector<1x128xf32>
      %20 = vector.broadcast %19 : vector<1x128xf32> to vector<8x128xf32>
      %21 = arith.addf %18, %20 : vector<8x128xf32>
      %c0_19 = arith.constant 0 : index
      %c0_20 = arith.constant 0 : index
      %22 = vector.load %arg7[%c0_19, %c0_20] : memref<8x128xf32, #tpu.memory_space<vmem>>, vector<8x128xf32>
      tpu.vector_store %arg7[%c0_19, %c0_20], %21 {strides = array<i32>} : memref<8x128xf32, #tpu.memory_space<vmem>>, vector<8x128xf32>,
    } else {
    }
    return
  }
  func.func @transform_0(%arg0: i32, %arg1: i32) -> (i32, i32) {
    %c0_i32 = arith.constant 0 : i32
    %c0_i32_0 = arith.constant 0 : i32
    return %arg0, %c0_i32 : i32, i32
  }
  func.func @transform_1(%arg0: i32, %arg1: i32) -> (i32, i32) {
    %c0_i32 = arith.constant 0 : i32
    %c0_i32_0 = arith.constant 0 : i32
    return %c0_i32, %arg1 : i32, i32
  }
  func.func @transform_2(%arg0: i32, %arg1: i32) -> (i32, i32) {
    %c0_i32 = arith.constant 0 : i32
    %c0_i32_0 = arith.constant 0 : i32
    return %c0_i32, %arg1 : i32, i32
  }
  func.func @transform_3(%arg0: i32, %arg1: i32) -> (i32, i32) {
    %c0_i32 = arith.constant 0 : i32
    %c0_i32_0 = arith.constant 0 : i32
    return %arg1, %c0_i32 : i32, i32
  }
  func.func @transform_4(%arg0: i32, %arg1: i32) -> (i32, i32) {
    %c0_i32 = arith.constant 0 : i32
    %c0_i32_0 = arith.constant 0 : i32
    %c0_i32_1 = arith.constant 0 : i32
    return %c0_i32, %c0_i32_0 : i32, i32
  }
  func.func @transform_5(%arg0: i32, %arg1: i32) -> (i32, i32) {
    %c0_i32 = arith.constant 0 : i32
    %c0_i32_0 = arith.constant 0 : i32
    return %arg0, %c0_i32 : i32, i32
  }
}

</mosaic_0001>

<bundles_post_ra>
// kernel: tpu_custom_call.1
= control target key start
LH: loop header
LB: loop body
LE: loop exit
PB: predicated region body
PF: predicated region fallthrough
CT: control target
= control target key end

     0   :  { %10 = vsyncpa [#allocation4], 0  ;;  %s1394_s0 = inlined_call_operand.hbm [shape: f32[16,128], index: 0, kind: input, shape index: {}]   ;;  %s1395_s1 = inlined_call_operand.hbm [shape: f32[128,128], index: 1, kind: input, shape index: {}]   ;;  %s1396_s2 = inlined_call_operand.vmem [shape: f32[1,128], index: 2, kind: input, shape index: {}]   ;;  %s1397_s3 = inlined_call_operand.hbm [shape: f32[128,128], index: 3, kind: input, shape index: {}]   ;;  %s1398_s4 = inlined_call_operand.vmem [shape: f32[1,128], index: 4, kind: input, shape index: {}]   ;;  %s1399_s5 = inlined_call_operand.hbm [shape: f32[16,128], index: 5, kind: output, shape index: {}]  }
   0x1   :  { %12 = vsyncpa [#allocation4 + $0x1], 0 }
   0x2   :  { %13 = vsyncpa [#allocation7], 0 }
   0x3   :  { %14 = vsyncpa [#allocation5], 0 }
   0x4   :  { %16 = vsyncpa [#allocation5 + $0x1], 0  ;;  %s1115_s18 = smov 0   ;;  %s1117_s19 = smov 0  }
   0x5   :  { %s1119_s20 = smov 0   ;;  %s1121_s21 = smov 0  }
   0x6   :  { %s1123_s22 = smov 0   ;;  %s1125_s23 = smov 0  }
   0x7 LB: > { %s640_s24 = sadd.s32 4294967295, %s1074_s23   ;;  %s641_s25 = sadd.s32 4294967294, %s1074_s23   ;;  %s1074_s23 = sphi %s1125_s23, %s22_s23   ;;  %s1070_s22 = sphi %s1123_s22, %s1421_s22   ;;  %s1066_s21 = sphi %s1121_s21, %s1420_s21   ;;  %s1062_s20 = sphi %s1119_s20, %s1419_s20   ;;  %s1058_s19 = sphi %s1117_s19, %s1418_s19   ;;  %s1054_s18 = sphi %s1115_s18, %s1417_s18  }
   0x8   : > { %p54_p0 = scmp.ne.s32.totalorder %s1058_s19, %s1054_s18  ;;  %p1149_p1 = scmp.eq.s32.totalorder %s640_s24, 0 }
   0x9   : > { %p1153_p2 = scmp.eq.s32.totalorder %s640_s24, 1  ;;  %p183_p3 = scmp.eq.s32.totalorder %s641_s25, 1 }
   0xa   : > { %s1404_s26 = scalar_select %p1149_p1, 1, 0 }
   0xb   : > { %p1159_p4 = por %p1149_p1, %p54_p0  ;;  %p642_p5 = scmp.ge.s32.totalorder %s1074_s23, 1 }
   0xc   : > { %p1164_p6 = por %p183_p3, %p54_p0  ;;  %p190_p7 = scmp.lt.s32.totalorder %s1074_s23, 3 }
   0xd   : > { %s1406_s28 = scalar_select %p1159_p4, 1, 0 }
   0xe   : > { %s1407_s29 = scalar_select %p1164_p6, 1, 0 }
   0xf   : > { %p1169_p8 = pnand %p642_p5, %p190_p7  ;;  %s1076_s6 = smov [#allocation6]  }
  0x10   : > { %s204_s7 = sshll.u32 %s1076_s6, 4  ;;  %s1077_s9 = smov [#allocation8]   ;;  %s1173_s7 = int_to_ptr.vmem [resolvable:$true] %s204_s7 }
  0x11   : > { %p824_p9 = pneg %p1169_p8  ;;  %s226_s10 = sshll.u32 %s1077_s9, 4  ;;  %s1184_s10 = int_to_ptr.vmem [resolvable:$true] %s226_s10 }
  0x12   : > { %s902_s13 = scalar_lea.hbm %s1395_s1, 2048 }
  0x13   : > { %p1180_p11 = pnand %p824_p9, %p1149_p1  ;;  %p903_p12 = scmp.ne.s32.totalorder %s1395_s1, %s902_s13 }
  0x14   : > { %p909_p5 = scmp.lt.u32.totalorder %s902_s13, %s1395_s1 }
  0x15   : > { %p904_p13 = pneg %p1180_p11 }
  0x17   : > { %p905_p0 = pnand %p904_p13, %p903_p12 }
  0x19   : > { %p906_p3 = pneg %p905_p0 }
  0x1b   : > { %p911_p7 = pnand %p909_p5, %p906_p3 }
  0x1d   : > { %914 = shalt.err (!%p911_p7)
}
  0x1e   : > { %s915_s24 = scalar_lea.vmem %s1173_s7, 2048  ;;  %p923_p1 = scmp.lt.s32.totalorder %s1173_s7, %s1173_s7 }
  0x1f   : > { %p916_p9 = scmp.ne.s32.totalorder %s1173_s7, %s915_s24  ;;  %p924_p12 = scmp.lt.s32.totalorder %s915_s24, %s915_s24 }
  0x21   : > { %p918_p10 = pnand %p916_p9, %p904_p13  ;;  %p925_p0 = por %p924_p12, %p923_p1 }
  0x23   : > { %p919_p6 = pneg %p918_p10 }
  0x25   : > { %p926_p4 = pnand %p925_p0, %p919_p6 }
  0x27   : > { %929 = shalt.err (!%p926_p4)
}
  0x28   : > { %s1078_s25 = smov 128   ;;  %s1079_s6 = smov 8  }
  0x29   : > { %827 = dma.hbm_to_vmem [thread:$0]  (!%p1180_p11), %s1395_s1, 2048, %s1173_s7, [#allocation7], %s1078_s25, %s1078_s25, %s1079_s6  }
  0x2a   : > { %s930_s14 = scalar_lea.hbm %s1397_s3, 2048 }
  0x2b   : > { %p931_p1 = scmp.ne.s32.totalorder %s1397_s3, %s930_s14  ;;  %p937_p10 = scmp.lt.u32.totalorder %s930_s14, %s1397_s3 }
  0x2d   : > { %p933_p4 = pnand %p931_p1, %p904_p13 }
  0x2f   : > { %p934_p6 = pneg %p933_p4 }
  0x31   : > { %p939_p3 = pnand %p937_p10, %p934_p6 }
  0x33   : > { %942 = shalt.err (!%p939_p3)
}
  0x34   : > { %s943_s7 = scalar_lea.vmem %s1184_s10, 2048  ;;  %p951_p12 = scmp.lt.s32.totalorder %s1184_s10, %s1184_s10 }
  0x35   : > { %p944_p5 = scmp.ne.s32.totalorder %s1184_s10, %s943_s7  ;;  %p952_p0 = scmp.lt.s32.totalorder %s943_s7, %s943_s7 }
  0x37   : > { %p946_p7 = pnand %p944_p5, %p904_p13  ;;  %p953_p1 = por %p952_p0, %p951_p12 }
  0x39   : > { %p947_p9 = pneg %p946_p7 }
  0x3b   : > { %p954_p4 = pnand %p953_p1, %p947_p9 }
  0x3d   : > { %957 = shalt.err (!%p954_p4)
}
  0x3e   : > { %830 = dma.hbm_to_vmem [thread:$0]  (!%p1180_p11), %s1397_s3, 2048, %s1184_s10, [#allocation7], %s1078_s25, %s1078_s25, %s1079_s6  }
  0x3f   : > { %s34_s12 = sadd.s32 1, %s1070_s22  ;;  %s41_s13 = sadd.s32 1, %s1062_s20 }
  0x40   : > { %p36_p13 = scmp.ge.s32.totalorder %s34_s12, 2  ;;  %p48_p6 = scmp.ne.s32.totalorder %s1062_s20, %s1058_s19 }
  0x41   : > { %p49_p10 = scmp.eq.s32.totalorder %s1074_s23, 0  ;;  %p841_p3 = scmp.lt.s32.totalorder %s1074_s23, 2 }
  0x42   : > { %s1423_s12 = smov (%p36_p13, %s34_s12), 0  ;;  %p1248_p7 = por %p1153_p2, %p48_p6 }
  0x43   : > { %p50_p5 = por %p49_p10, %p48_p6  ;;  %s38_s14 = ssub.s32 %s1070_s22, %s1423_s12 }
  0x44   : > { %s1410_s8 = scalar_select %p1248_p7, 1, 0 }
  0x45   : > { %s243_s15 = sand.u32 1, %s1062_s20   ;;  %p39_p9 = scmp.eq.s32.totalorder %s38_s14, 0 }
  0x46   : > { %s647_s10 = sshll.u32 %s243_s15, 3  ;;  %s648_s25 = sshll.u32 %s1070_s22, 7 }
  0x47   : > { %s1257_s6 = scalar_select %p39_p9, %s1062_s20, %s41_s13  }
  0x48   : > { %s1262_s24 = scalar_lea.hbm %s1394_s0, %s648_s25  ;;  %s247_s27 = scalar_lea.vmem [#allocation3], %s647_s10 }
  0x49   : > { %s254_s7 = sshll.u32 %s247_s27, 4  ;;  %p1266_p2 = pnand %p841_p3, %p50_p5  ;;  %s1270_s7 = int_to_ptr.vmem [resolvable:$true] %s254_s7 }
  0x4a   : > { %s244_s11 = scalar_lea.sflag [#allocation4], %s243_s15  ;;  %s958_s13 = scalar_lea.hbm %s1262_s24, 128 }
  0x4b   : > { %p959_p11 = scmp.ne.s32.totalorder %s1262_s24, %s958_s13  ;;  %p960_p12 = pneg %p1266_p2 }
  0x4c   : > { %s963_s25 = scalar_lea.hbm %s1394_s0, 256  ;;  %p964_p4 = scmp.lt.u32.totalorder %s1262_s24, %s1394_s0 }
  0x4d   : > { %p961_p0 = pnand %p960_p12, %p959_p11  ;;  %p965_p13 = scmp.lt.u32.totalorder %s963_s25, %s958_s13 }
  0x4e   : > { %p967_p10 = scmp.lt.u32.totalorder %s958_s13, %s1262_s24 }
  0x4f   : > { %p962_p1 = pneg %p961_p0  ;;  %p966_p6 = por %p965_p13, %p964_p4 }
  0x51   : > { %p968_p3 = por %p967_p10, %p966_p6 }
  0x53   : > { %p969_p5 = pnand %p968_p3, %p962_p1 }
  0x55   : > { %972 = shalt.err (!%p969_p5)
}
  0x56   : > { %s973_s15 = scalar_lea.vmem %s1270_s7, 128  ;;  %s1080_s27 = smov [#allocation3]  }
  0x57   : > { %p974_p9 = scmp.ne.s32.totalorder %s1270_s7, %s973_s15  ;;  %s978_s14 = sshll.u32 %s1080_s27, 4  ;;  %s979_s14 = int_to_ptr.vmem [resolvable:$false] %s978_s14 }
  0x58   : > { %s980_s10 = scalar_lea.vmem %s979_s14, 256  ;;  %p981_p7 = scmp.lt.s32.totalorder %s1270_s7, %s979_s14 }
  0x59   : > { %p976_p11 = pnand %p974_p9, %p960_p12  ;;  %p982_p4 = scmp.lt.s32.totalorder %s980_s10, %s973_s15 }
  0x5b   : > { %p977_p0 = pneg %p976_p11  ;;  %p983_p13 = por %p982_p4, %p981_p7 }
  0x5d   : > { %p984_p6 = pnand %p983_p13, %p977_p0 }
  0x5f   : > { %987 = shalt.err (!%p984_p6)
}
  0x60   : > { %834 = dma.hbm_to_vmem [thread:$0]  (!%p1266_p2), %s1262_s24, 128, %s1270_s7, %s244_s11  }
  0x61   : > { %263 = sbr.rel (%p1169_p8) target bundleno = 596 (0x254), region = 40  ;;  %s1300_s13 = sand.u32 (!%p1169_p8), 1, %s1058_s19  }
  0x62   : > { %s650_s25 = sshll.u32 (!%p1169_p8), %s1300_s13, 3  ;;  %s266_s16 = scalar_lea.sflag (!%p1169_p8), [#allocation4], %s1300_s13 }
  0x63   : > { %s1306_s17 = scalar_lea.vmem (!%p1169_p8), [#allocation3], %s650_s25  ;;  %p1412_p7 = scmp.ne.s32.totalorder (!%p1169_p8), %s1406_s28, 0 }
  0x68   : > { %1041 = dma.done.wait (%p1412_p7), %s266_s16, 128  }
  0x69   : > { %1043 = vsyncadd (%p1412_p7), %s266_s16, 4294967168  ;;  %p1413_p2 = scmp.ne.s32.totalorder %s1404_s26, 0 }
  0x6b   : > { %1045 = dma.done.wait (%p1413_p2), [#allocation7], 4096  }
  0x6c   : > { %1047 = vsyncadd (%p1413_p2), [#allocation7], 4294963200  ;;  %v1081_v0 = vmov 0.0|0.0   ;;  %vm1082_vm0 = vmmov 0   ;;  %v1083_v1 = vmov 0.0   ;;  %v317_v2 = vld [vmem:[#allocation6] sm:$0xff] }
  0x6d   : > { %764 = vmatprep.subr.bf16.mxu0 %v1081_v0  ;;  %726 = vmatprep.mubr.msk.f32.mxu0 %vm1082_vm0, %v1083_v1  ;;  %v318_v3 = vld [vmem:[#allocation6 + $0x8] sm:$0xff]  ;;  %v319_v4 = vld [vmem:[#allocation6 + $0x10] sm:$0xff]  ;;  %v320_v6 = vld [vmem:[#allocation6 + $0x18] sm:$0xff]  ;;  %s657_s7 = sshll.u32 %s1066_s21, 7  ;;  %s306_s9 = scalar_lea.vmem [#allocation9], %s650_s25 }
  0x6e   : > { %788 = vmatprep.subr.bf16.mxu1 %v1081_v0  ;;  %761 = vmatprep.mubr.msk.f32.mxu1 %vm1082_vm0, %v1083_v1  ;;  %v765_v5 = vpack.c.bf16 %v318_v3, %v317_v2  ;;  %v768_v7 = vpack.c.bf16 %v320_v6, %v319_v4  ;;  %v321_v8 = vld [vmem:[#allocation6 + $0x20] sm:$0xff]  ;;  %v322_v9 = vld [vmem:[#allocation6 + $0x28] sm:$0xff]  ;;  %v414_v12 = vld [vmem:[#allocation8 + $0x10] sm:$0xff]  ;;  %s527_s11 = sshll.u32 %s306_s9, 4  ;;  %s1345_s14 = scalar_lea.hbm %s1399_s5, %s657_s7  ;;  %s1347_s11 = int_to_ptr.vmem [resolvable:$true] %s527_s11 }
  0x6f   : > { %v412_v10 = vld [vmem:[#allocation8] sm:$0xff]  ;;  %v413_v11 = vld [vmem:[#allocation8 + $0x8] sm:$0xff]  ;;  %v415_v13 = vld [vmem:[#allocation8 + $0x18] sm:$0xff]  ;;  %v771_v14 = vpack.c.bf16 %v322_v9, %v321_v8  ;;  %s514_s10 = scalar_lea.sflag [#allocation5], %s1300_s13  ;;  %s988_s16 = scalar_lea.vmem %s1347_s11, 128 }
  0x70   : > { %766 = vmatpush3.bf16.msra.mxu0 %v765_v5  ;;  %v789_v15 = vpack.c.bf16 %v413_v11, %v412_v10  ;;  %v323_v16 = vld [vmem:[#allocation6 + $0x30] sm:$0xff]  ;;  %v324_v17 = vld [vmem:[#allocation6 + $0x38] sm:$0xff]  ;;  %v792_v18 = vpack.c.bf16 %v415_v13, %v414_v12  ;;  %v416_v19 = vld [vmem:[#allocation8 + $0x20] sm:$0xff]  ;;  %p989_p8 = scmp.ne.s32.totalorder %s1347_s11, %s988_s16  ;;  %p1414_p12 = scmp.ne.s32.totalorder %s1410_s8, 0 }
  0x71   : > { %767 = vmatprep.subr.bf16.mxu0 %v1081_v0  ;;  %v417_v20 = vld [vmem:[#allocation8 + $0x28] sm:$0xff]  ;;  %v774_v21 = vpack.c.bf16 %v324_v17, %v323_v16  ;;  %v325_v22 = vld [vmem:[#allocation6 + $0x40] sm:$0xff]  ;;  %v418_v25 = vld [vmem:[#allocation8 + $0x30] sm:$0xff]  ;;  %s1084_s21 = smov [#allocation9]  }
  0x72   : > { %790 = vmatpush3.bf16.msra.mxu1 %v789_v15  ;;  %v326_v23 = vld [vmem:[#allocation6 + $0x48] sm:$0xff]  ;;  %v795_v24 = vpack.c.bf16 %v417_v20, %v416_v19  ;;  %v419_v26 = vld [vmem:[#allocation8 + $0x38] sm:$0xff]  ;;  %v327_v28 = vld [vmem:[#allocation6 + $0x50] sm:$0xff]  ;;  %p990_p1 = pnand %p989_p8, %p1414_p12  ;;  %s992_s25 = sshll.u32 %s1084_s21, 4  ;;  %s993_s25 = int_to_ptr.vmem [resolvable:$false] %s992_s25 }
  0x73   : > { %791 = vmatprep.subr.bf16.mxu1 %v1081_v0  ;;  %v777_v27 = vpack.c.bf16 %v326_v23, %v325_v22  ;;  %v328_v29 = vld [vmem:[#allocation6 + $0x58] sm:$0xff]  ;;  %v798_v30 = vpack.c.bf16 %v419_v26, %v418_v25  ;;  %v420_v31 = vld [vmem:[#allocation8 + $0x40] sm:$0xff]  ;;  %v421_v32 = vld [vmem:[#allocation8 + $0x48] sm:$0xff]  ;;  %p995_p3 = scmp.lt.s32.totalorder %s1347_s11, %s993_s25 }
  0x74   : > { %769 = vmatpush3.bf16.msra.mxu0 %v768_v7  ;;  %v780_v33 = vpack.c.bf16 %v328_v29, %v327_v28  ;;  %v329_v34 = vld [vmem:[#allocation6 + $0x60] sm:$0xff]  ;;  %v330_v35 = vld [vmem:[#allocation6 + $0x68] sm:$0xff]  ;;  %v801_v36 = vpack.c.bf16 %v421_v32, %v420_v31  ;;  %v331_v38 = vld [vmem:[#allocation6 + $0x70] sm:$0xff]  ;;  %p991_p10 = pneg %p990_p1 }
  0x75   : > { %770 = vmatprep.subr.bf16.mxu0 %v1081_v0  ;;  %v783_v37 = vpack.c.bf16 %v330_v35, %v329_v34  ;;  %v332_v39 = vld [vmem:[#allocation6 + $0x78] sm:$0xff]  ;;  %v422_v42 = vld [vmem:[#allocation8 + $0x50] sm:$0xff]  ;;  %v424_v45 = vld [vmem:[#allocation8 + $0x60] sm:$0xff] }
  0x76   : > { %793 = vmatpush3.bf16.msra.mxu1 %v792_v18  ;;  %v786_v40 = vpack.c.bf16 %v332_v39, %v331_v38  ;;  %v316_v41 = vld [vmem:[%s1306_s17] sm:$0xff]  ;;  %v425_v46 = vld [vmem:[#allocation8 + $0x68] sm:$0xff]  ;;  %s994_s17 = scalar_lea.vmem %s993_s25, 256 }
  0x77   : > { %794 = vmatprep.subr.bf16.mxu1 %v1081_v0  ;;  %v423_v43 = vld [vmem:[#allocation8 + $0x58] sm:$0xff]  ;;  %v807_v47 = vpack.c.bf16 %v425_v46, %v424_v45  ;;  %v426_v48 = vld [vmem:[#allocation8 + $0x70] sm:$0xff]  ;;  %p996_p5 = scmp.lt.s32.totalorder %s994_s17, %s988_s16 }
  0x78   : > { %772 = vmatpush3.bf16.msra.mxu0 %v771_v14  ;;  %v804_v44 = vpack.c.bf16 %v423_v43, %v422_v42  ;;  %v427_v49 = vld [vmem:[#allocation8 + $0x78] sm:$0xff]  ;;  %v654_v51 = vld [vmem:[%s1396_s2] ss:$0 sm:$0xff] }
  0x79   : > { %773 = vmatprep.subr.bf16.mxu0 %v1081_v0  ;;  %v810_v50 = vpack.c.bf16 %v427_v49, %v426_v48  ;;  %v655_v56 = vld [vmem:[%s1398_s4] ss:$0 sm:$0xff]  ;;  %p997_p9 = por %p996_p5, %p995_p3 }
  0x7a   : > { %796 = vmatpush3.bf16.msra.mxu1 %v795_v24 }
  0x7b   : > { %797 = vmatprep.subr.bf16.mxu1 %v1081_v0  ;;  %p998_p11 = pnand %p997_p9, %p991_p10 }
  0x7c   : > { %775 = vmatpush3.bf16.msra.mxu0 %v774_v21 }
  0x7d   : > { %776 = vmatprep.subr.bf16.mxu0 %v1081_v0 }
  0x7e   : > { %799 = vmatpush3.bf16.msra.mxu1 %v798_v30 }
  0x7f   : > { %800 = vmatprep.subr.bf16.mxu1 %v1081_v0 }
  0x80   : > { %778 = vmatpush3.bf16.msra.mxu0 %v777_v27 }
  0x81   : > { %779 = vmatprep.subr.bf16.mxu0 %v1081_v0 }
  0x82   : > { %802 = vmatpush3.bf16.msra.mxu1 %v801_v36 }
  0x83   : > { %803 = vmatprep.subr.bf16.mxu1 %v1081_v0 }
  0x84   : > { %781 = vmatpush3.bf16.msra.mxu0 %v780_v33 }
  0x85   : > { %782 = vmatprep.subr.bf16.mxu0 %v1081_v0 }
  0x86   : > { %805 = vmatpush3.bf16.msra.mxu1 %v804_v44 }
  0x87   : > { %806 = vmatprep.subr.bf16.mxu1 %v1081_v0 }
  0x88   : > { %784 = vmatpush3.bf16.msra.mxu0 %v783_v37 }
  0x89   : > { %785 = vmatprep.subr.bf16.mxu0 %v1081_v0 }
  0x8a   : > { %808 = vmatpush3.bf16.msra.mxu1 %v807_v47 }
  0x8b   : > { %809 = vmatprep.subr.bf16.mxu1 %v1081_v0 }
  0x8c   : > { %787 = vmatpush3.bf16.msra.mxu0 %v786_v40 }
  0x8e   : > { %811 = vmatpush3.bf16.msra.mxu1 %v810_v50 }
  0x8f   : > { %727 = vmatmul.mubr.f32.vlgmr.msra.gmra.mrb[0].mxu0 %v316_v41 }
 0x162   : > { %v406_v52 = vpop.f32.mrb[0].mxu0 }
 0x163   : > { %v407_v53 = vadd.f32 %v654_v51, %v406_v52  ;;  %v728_v54 = vpop.f32.mrb[1].mxu0 }
 0x165   : > { %900 = vtanh.f32 %v407_v53 }
 0x16f   : > { %v901_v55 = vpop.eup %900 }
 0x170   : > { %762 = vmatmul.mubr.f32.vlgmr.msra.gmra.mrb[0].mxu1 %v901_v55 }
 0x243   : > { %v494_v57 = vpop.f32.mrb[0].mxu1 }
 0x244   : > { %v511_v58 = vadd.f32 %v655_v56, %v494_v57  ;;  %v763_v59 = vpop.f32.mrb[1].mxu1 }
 0x246   : > { %512 = vst [vmem:[%s306_s9] sm:$0xff] %v511_v58 }
 0x247   : > { %1001 = shalt.err (!%p998_p11)
}
 0x248   : > { %s1002_s13 = scalar_lea.hbm %s1345_s14, 128  ;;  %s1006_s30 = scalar_lea.hbm %s1399_s5, 256 }
 0x249   : > { %p1003_p0 = scmp.ne.s32.totalorder %s1345_s14, %s1002_s13  ;;  %p1007_p6 = scmp.lt.u32.totalorder %s1345_s14, %s1399_s5 }
 0x24a   : > { %p1008_p7 = scmp.lt.u32.totalorder %s1006_s30, %s1002_s13  ;;  %p1010_p8 = scmp.lt.u32.totalorder %s1002_s13, %s1345_s14 }
 0x24b   : > { %p1004_p4 = pnand %p1003_p0, %p1414_p12 }
 0x24c   : > { %p1009_p2 = por %p1008_p7, %p1007_p6 }
 0x24d   : > { %p1005_p13 = pneg %p1004_p4 }
 0x24e   : > { %p1011_p1 = por %p1010_p8, %p1009_p2 }
 0x250   : > { %p1012_p10 = pnand %p1011_p1, %p1005_p13 }
 0x252   : > { %1015 = shalt.err (!%p1012_p10)
}
 0x253   : > { %822 = dma.vmem_to_hbm [thread:$0]  (%p1414_p12), %s1347_s11, 128, %s1345_s14, %s514_s10  }
 0x254 PF: > { %s539_s9 = sand.u32 1, %s1054_s18   ;;  %p1415_p3 = scmp.ne.s32.totalorder %s1407_s29, 0 }
 0x255   : > { %p1416_p5 = scmp.ge.s32.totalorder %s1074_s23, 2  ;;  %s540_s15 = scalar_lea.sflag [#allocation5], %s539_s9 }
 0x257   : > { %p836_p9 = pnand %p1416_p5, %p1415_p3 }
 0x259   : > { %1049 = dma.done.wait (!%p836_p9), %s540_s15, 128  }
 0x25a   : > { %1051 = vsyncadd (!%p836_p9), %s540_s15, 4294967168  ;;  %s22_s23 = sadd.s32 1, %s1074_s23   ;;  %s1417_s18 = smov %s1058_s19 }
 0x25b   : > { %p19_p11 = scmp.ge.s32.totalorder %s22_s23, 4   ;;  %s1418_s19 = smov %s1062_s20 }
 0x25c   : > { %s1419_s20 = smov %s1257_s6  ;;  %s1420_s21 = smov %s1070_s22 }
 0x25d   : > { %s1421_s22 = smov %s1423_s12  ;;  %21 = sbr.rel (!%p19_p11) target bundleno = 7 (0x7), region = 106 }
 0x264   :  { %545 = vsyncpa [#allocation4], 1 }
 0x265   :  { %547 = vsyncpa [#allocation4 + $0x1], 1 }
 0x266   :  { %548 = vsyncpa [#allocation7], 1 }
 0x267   :  { %549 = vsyncpa [#allocation5], 1 }
 0x268   :  { %551 = vsyncpa [#allocation5 + $0x1], 1 }

</bundles_post_ra>
